<compile_context>
chip_gen: v6e
topology: v6e:2x2x1
jax: 0.10.0
libtpu: 0.0.40
codegen_flags: <defaults>
</compile_context>

<pallas_src>
import functools

import jax
import jax.numpy as jnp
from jax.experimental import pallas as pl
from jax.experimental.pallas import tpu as pltpu

EPS = 1e-06
_LANE = 128
_HARD_ROW_CAP = 16 * 1024 * 1024   # pad C to the sublane tile above this row size


def _gemhpp_kernel(p_ref, x_ref, pool_ref, o_ref):
    """Fused GeM pyramid pooling for one (n_blk, c_blk) block.

    p_ref    : SMEM scalar-prefetch ref, shape (1,)   -- learnable exponent p
    x_ref    : VMEM ref, shape (n_blk, c_blk, HW)     -- spatial axis on lanes
    pool_ref : VMEM ref, shape (HW, B_pad)            -- per-bin 1/seg_len averaging matrix
    o_ref    : VMEM ref, shape (n_blk, c_blk, B_pad)  -- B_pad = 128-padded bin count
    """
    p = p_ref[0]
    inv_p = 1.0 / p
    nb, cb, hw = x_ref.shape
    b_pad = o_ref.shape[-1]

    x = x_ref[...]
    if x.dtype != jnp.float32:               # bf16 inputs supported (compute in f32)
        x = x.astype(jnp.float32)
    x = jnp.maximum(x, EPS)                  # clamp(min=eps)
    y = jnp.exp(p * jnp.log(x))              # x^p (x > 0), lane-dense over HW

    # Per-bin means for every pyramid level at once, on the MXU.
    # Default precision: pool entries are powers of two (bf16-exact) and the
    # 1/p root divides the relative error, so a single bf16 pass suffices.
    # The (nb, cb) merge is layout-free: either nb == 1 or cb % sublane-tile == 0.
    means = jnp.dot(
        y.reshape(nb * cb, hw),
        pool_ref[...],
        preferred_element_type=jnp.float32,
    )                                        # (nb*cb, B_pad)

    # (.)^(1/p); padded (zero) columns give log(0) = -inf -> exp(-inf) = 0,
    # matching 0^(1/p), and are sliced off in the wrapper.
    o = jnp.exp(jnp.log(means) * inv_p)
    o_ref[...] = o.reshape(nb, cb, b_pad).astype(o_ref.dtype)


def _make_pool_matrix(hw, bin_num, b_pad):
    """(HW, b_pad) matrix whose columns average each bin's spatial segment (zero-padded)."""
    cols = []
    pos = jnp.arange(hw)
    for b in bin_num:
        s = hw // b
        seg = (pos[:, None] // s) == jnp.arange(b)[None, :]
        cols.append(seg.astype(jnp.float32) * (1.0 / s))
    b_total = sum(bin_num)
    if b_pad > b_total:
        cols.append(jnp.zeros((hw, b_pad - b_total), dtype=jnp.float32))
    return jnp.concatenate(cols, axis=-1)


def _sublane_tile(itemsize):
    return {4: 8, 2: 16, 1: 32}.get(itemsize, 8)


def _pick_blocks(n, c, hw, itemsize):
    """Choose (n_blk, c_blk) so reshapes stay layout-free and VMEM fits on every chip."""
    sub = _sublane_tile(itemsize)
    # Budget the *f32 temporary* (x^p) at ~8 MiB per block; the input block is
    # itemsize/4 of that, so 2x double-buffered input + the f32 temps stay well
    # under the 48 MiB scoped VMEM limit (v7x has only 64 MiB physical per TC).
    target_bytes = (8 * 1024 * 1024 * itemsize) // 4
    row_bytes = c * hw * itemsize

    if c % sub == 0:
        if row_bytes > target_bytes:
            c_blk = sub
            for cb in range(sub, c + 1, sub):
                if c % cb == 0 and cb * hw * itemsize <= target_bytes:
                    c_blk = cb
            n_blk = 1
        else:
            c_blk = c
            n_blk = max(1, min(n, target_bytes // max(1, row_bytes)))
            while n % n_blk != 0:
                n_blk -= 1
    else:
        # c not a multiple of the sublane tile: merging (n_blk, c_blk) in the
        # kernel reshape would force a VMEM relayout, so keep n_blk = 1 (the
        # reshape is then a free squeeze).  Oversized-C cases are padded to a
        # multiple of `sub` in the wrapper before reaching here.
        c_blk = c
        n_blk = 1

    # Keep >=2 grid steps when possible so both v7x TensorCores get work.
    if (n // n_blk) * (c // c_blk) < 2:
        if n_blk > 1:
            n_blk = max(1, n_blk // 2)
            while n % n_blk != 0:
                n_blk -= 1
        elif c_blk % (2 * sub) == 0 and c_blk > sub:
            c_blk //= 2
    return n_blk, c_blk


def _gemhpp_pallas(x_flat, p, pool, b_pad):
    n, c, hw = x_flat.shape
    itemsize = jnp.dtype(x_flat.dtype).itemsize
    n_blk, c_blk = _pick_blocks(n, c, hw, itemsize)
    grid = (n // n_blk, c // c_blk)

    grid_spec = pltpu.PrefetchScalarGridSpec(
        num_scalar_prefetch=1,
        grid=grid,
        in_specs=[
            pl.BlockSpec((n_blk, c_blk, hw), lambda ni, ci, p_ref: (ni, ci, 0)),
            pl.BlockSpec((hw, b_pad), lambda ni, ci, p_ref: (0, 0)),
        ],
        out_specs=pl.BlockSpec((n_blk, c_blk, b_pad),
                               lambda ni, ci, p_ref: (ni, ci, 0)),
    )

    cost = pl.CostEstimate(
        flops=2 * n * c * hw * b_pad + 4 * n * c * hw,
        transcendentals=2 * n * c * hw + 2 * n * c * b_pad,
        bytes_accessed=(n * c * hw * itemsize
                        + n * c * b_pad * itemsize
                        + hw * b_pad * 4),
    )

    return pl.pallas_call(
        _gemhpp_kernel,
        out_shape=jax.ShapeDtypeStruct((n, c, b_pad), x_flat.dtype),
        grid_spec=grid_spec,
        compiler_params=pltpu.CompilerParams(
            dimension_semantics=("parallel", "parallel"),
            vmem_limit_bytes=48 * 1024 * 1024,
        ),
        cost_estimate=cost,
    )(p, x_flat, pool)


@functools.partial(jax.jit, static_argnames=("bin_num",))
def gemhpp_forward(x, p, bin_num=(64,)):
    """x: [n, c, h, w] -> [n, c, sum(bin_num)]   (matches GeMHPP.forward)."""
    n, c, h, w = x.shape
    hw = h * w
    for b in bin_num:
        if hw % b != 0:
            raise ValueError(f"h*w={hw} not divisible by bin count {b}")
    b_total = sum(bin_num)
    b_pad = max(_LANE, ((b_total + _LANE - 1) // _LANE) * _LANE)

    itemsize = jnp.dtype(x.dtype).itemsize
    sub = _sublane_tile(itemsize)

    x_flat = x.reshape(n, c, hw)              # free row-major reshape (glue in JAX)
    # If C is not a multiple of the sublane tile and the per-row block would be
    # too big for v7x's VMEM, pad C so the block heuristic can tile channels.
    if c % sub != 0 and c * hw * itemsize > _HARD_ROW_CAP:
        c_padded = ((c + sub - 1) // sub) * sub
        x_flat = jnp.pad(x_flat, ((0, 0), (0, c_padded - c), (0, 0)))

    pool = _make_pool_matrix(hw, bin_num, b_pad)   # static -> constant-folded under jit
    out = _gemhpp_pallas(x_flat, p, pool, b_pad)
    return out[:, :c, :b_total]               # drop channel padding + padded bin lanes


def _reference(x, p, bin_num):
    """Pure-JAX reference of the PyTorch forward for correctness checking."""
    n, c, h, w = x.shape
    feats = []
    pv = p[0]
    for b in bin_num:
        z = x.reshape(n, c, b, -1)
        z = jnp.maximum(z, EPS)
        z = jnp.mean(z ** pv, axis=-1) ** (1.0 / pv)
        feats.append(z)
    return jnp.concatenate(feats, axis=-1)


if __name__ == "__main__":
    key = jax.random.PRNGKey(0)
    # Small shapes consistent with the module: default bin_num=[64] requires
    # h*w divisible by 64 -> x: [n=2, c=4, h=64, w=16].
    n, c, h, w = 2, 4, 64, 16
    x = jax.random.normal(key, (n, c, h, w), dtype=jnp.float32)
    # Parameter init per __init__: p = ones(1) * 6.5
    p = jnp.ones((1,), dtype=jnp.float32) * 6.5

    # Default config (bin_num=[64]).
    bin_num = (64,)
    out = jax.block_until_ready(gemhpp_forward(x, p, bin_num=bin_num))
    assert out.shape == (n, c, sum(bin_num)), out.shape
    ref = jax.block_until_ready(_reference(x, p, bin_num))
    assert jnp.allclose(out, ref, rtol=1e-3, atol=1e-6), (
        float(jnp.max(jnp.abs(out - ref))))

    # Pyramid config exercising the fused multi-bin path (single pallas_call,
    # B_total=127 padded to 128 lanes).
    bin_num2 = (1, 2, 4, 8, 16, 32, 64)
    out2 = jax.block_until_ready(gemhpp_forward(x, p, bin_num=bin_num2))
    assert out2.shape == (n, c, sum(bin_num2)), out2.shape
    ref2 = jax.block_until_ready(_reference(x, p, bin_num2))
    assert jnp.allclose(out2, ref2, rtol=1e-3, atol=1e-6), (
        float(jnp.max(jnp.abs(out2 - ref2))))

    print("KERNEL_OK")
</pallas_src>

<mosaic_0001>
module attributes {stable_mosaic.version = 11 : i64} {
  func.func @_gemhpp_kernel(%arg0: i32, %arg1: i32, %arg2: memref<1xf32, #tpu.memory_space<smem>>, %arg3: memref<1x4x1024xf32, #tpu.memory_space<vmem>>, %arg4: memref<1024x128xf32, #tpu.memory_space<vmem>>, %arg5: memref<1x4x128xf32, #tpu.memory_space<vmem>>) attributes {dimension_semantics = [#tpu.dimension_semantics<parallel>, #tpu.dimension_semantics<parallel>], iteration_bounds = array<i64: 2, 1>, scalar_prefetch = 1 : i64, scratch_operands = 0 : i64, tpu.core_type = #tpu.core_type<tc>, window_params = [{transform_indices = @transform_0, window_bounds = array<i64: 1, 4, 1024>}, {pipeline_mode = #tpu.pipeline_mode<synchronous>, transform_indices = @transform_1, window_bounds = array<i64: 1024, 128>}, {transform_indices = @transform_2, window_bounds = array<i64: 1, 4, 128>}]} {
    %c0 = arith.constant 0 : index
    %0 = memref.load %arg2[%c0] : memref<1xf32, #tpu.memory_space<smem>>
    %cst = arith.constant 1.000000e+00 : f32
    %1 = arith.divf %cst, %0 : f32
    %c0_0 = arith.constant 0 : index
    %c0_1 = arith.constant 0 : index
    %c0_2 = arith.constant 0 : index
    %2 = vector.load %arg3[%c0_0, %c0_1, %c0_2] : memref<1x4x1024xf32, #tpu.memory_space<vmem>>, vector<1x4x1024xf32>
    %cst_3 = arith.constant 9.99999997E-7 : f32
    %3 = vector.broadcast %cst_3 : f32 to vector<1x4x1024xf32>
    %4 = arith.maximumf %2, %3 : vector<1x4x1024xf32>
    %5 = math.log %4 : vector<1x4x1024xf32>
    %6 = vector.broadcast %0 : f32 to vector<1x4x1024xf32>
    %7 = arith.mulf %6, %5 : vector<1x4x1024xf32>
    %8 = math.exp %7 : vector<1x4x1024xf32>
    %9 = vector.shape_cast %8 : vector<1x4x1024xf32> to vector<4x1024xf32>
    %c0_4 = arith.constant 0 : index
    %c0_5 = arith.constant 0 : index
    %10 = vector.load %arg4[%c0_4, %c0_5] : memref<1024x128xf32, #tpu.memory_space<vmem>>, vector<1024x128xf32>
    %cst_6 = arith.constant dense<0.000000e+00> : vector<4x128xf32>
    %11 = tpu.matmul %9, %10, %cst_6 {dimension_numbers = #tpu.dot_dimension_numbers<[1], [0], [0], [1], [0, 0, 1, 1], [], []>} : vector<4x1024xf32>, vector<1024x128xf32>, vector<4x128xf32> -> vector<4x128xf32>
    %12 = math.log %11 : vector<4x128xf32>
    %13 = vector.broadcast %1 : f32 to vector<4x128xf32>
    %14 = arith.mulf %12, %13 : vector<4x128xf32>
    %15 = math.exp %14 : vector<4x128xf32>
    %16 = vector.shape_cast %15 : vector<4x128xf32> to vector<1x4x128xf32>
    %c0_7 = arith.constant 0 : index
    %c0_8 = arith.constant 0 : index
    %c0_9 = arith.constant 0 : index
    %17 = vector.load %arg5[%c0_7, %c0_8, %c0_9] : memref<1x4x128xf32, #tpu.memory_space<vmem>>, vector<1x4x128xf32>
    tpu.vector_store %arg5[%c0_7, %c0_8, %c0_9], %16 {strides = array<i32>} : memref<1x4x128xf32, #tpu.memory_space<vmem>>, vector<1x4x128xf32>,
    return
  }
  func.func @transform_0(%arg0: i32, %arg1: i32, %arg2: memref<1xf32, #tpu.memory_space<smem>>) -> (i32, i32, i32) {
    %c0_i32 = arith.constant 0 : i32
    %c0_i32_0 = arith.constant 0 : i32
    return %arg0, %arg1, %c0_i32 : i32, i32, i32
  }
  func.func @transform_1(%arg0: i32, %arg1: i32, %arg2: memref<1xf32, #tpu.memory_space<smem>>) -> (i32, i32) {
    %c0_i32 = arith.constant 0 : i32
    %c0_i32_0 = arith.constant 0 : i32
    %c0_i32_1 = arith.constant 0 : i32
    return %c0_i32, %c0_i32_0 : i32, i32
  }
  func.func @transform_2(%arg0: i32, %arg1: i32, %arg2: memref<1xf32, #tpu.memory_space<smem>>) -> (i32, i32, i32) {
    %c0_i32 = arith.constant 0 : i32
    %c0_i32_0 = arith.constant 0 : i32
    return %arg0, %arg1, %c0_i32 : i32, i32, i32
  }
}

</mosaic_0001>

<bundles_post_ra>
// kernel: gemhpp_forward.1
= control target key start
LH: loop header
LB: loop body
LE: loop exit
PB: predicated region body
PF: predicated region fallthrough
CT: control target
= control target key end

     0   :  { %s1565_s0 = inlined_call_operand.<no memory space> [shape: f32[1], index: 0, kind: input, shape index: {}]   ;;  %s1566_s1 = inlined_call_operand.vmem [shape: f32[2,4,1024], index: 1, kind: input, shape index: {}]   ;;  %s1567_s2 = inlined_call_operand.vmem [shape: f32[1024,128], index: 2, kind: input, shape index: {}]   ;;  %s1568_s3 = inlined_call_operand.hbm [shape: f32[2,4,128], index: 3, kind: output, shape index: {}]  }
   0x1   :  { %8 = sst [smem:[#allocation3]] %s1565_s0 }
   0x2   :  { %9 = vsyncpa [#allocation5], 0 }
   0x3   :  { %11 = vsyncpa [#allocation5 + $0x1], 0  ;;  %s1058_s14 = smov 0   ;;  %s1060_s15 = smov 0  }
   0x4   :  { %s1062_s16 = smov 0   ;;  %s1064_s17 = smov 0  }
   0x5   :  { %s1066_s18 = smov 0   ;;  %s1068_s19 = smov 0  }
   0x6 LB: > { %s724_s0 = sadd.s32 4294967295, %s1032_s19   ;;  %s725_s20 = sadd.s32 4294967294, %s1032_s19   ;;  %s1032_s19 = sphi %s1068_s19, %s17_s19   ;;  %s1028_s18 = sphi %s1066_s18, %s1575_s18   ;;  %s1024_s17 = sphi %s1064_s17, %s1574_s17   ;;  %s1020_s16 = sphi %s1062_s16, %s1573_s16   ;;  %s1016_s15 = sphi %s1060_s15, %s1572_s15   ;;  %s1012_s14 = sphi %s1058_s14, %s1571_s14  }
   0x7   : > { %s29_s21 = sadd.s32 1, %s1028_s18  ;;  %s87_s22 = sadd.s32 1, %s1020_s16 }
   0x8   : > { %p31_p0 = scmp.ge.s32.totalorder %s29_s21, 2  ;;  %p97_p1 = scmp.ne.s32.totalorder %s1020_s16, %s1016_s15 }
   0x9   : > { %p98_p2 = scmp.eq.s32.totalorder %s724_s0, 1  ;;  %p103_p3 = scmp.ne.s32.totalorder %s1016_s15, %s1012_s14 }
   0xa   : > { %s1577_s21 = smov (%p31_p0, %s29_s21), 0  ;;  %p104_p5 = scmp.eq.s32.totalorder %s725_s20, 1 }
   0xb   : > { %p1098_p4 = por %p98_p2, %p97_p1  ;;  %s82_s24 = ssub.s32 %s1028_s18, %s1577_s21 }
   0xc   : > { %p728_p6 = scmp.ge.s32.totalorder %s1032_s19, 1  ;;  %p85_p7 = scmp.eq.s32.totalorder %s82_s24, 0 }
   0xd   : > { %p1105_p8 = por %p104_p5, %p103_p3  ;;  %p137_p9 = scmp.lt.s32.totalorder %s1032_s19, 3 }
   0xe   : > { %s1111_s26 = scalar_select %p85_p7, %s1020_s16, %s87_s22  }
   0xf   : > { %p138_p10 = pnand %p728_p6, %p137_p9 }
  0x10   : > { %p163_p11 = scmp.lt.s32.totalorder (!%p138_p10), %s1024_s17, 1  ;;  %s172_s10 = sld [smem:[#allocation3]] (!%p138_p10) }
  0x11   : > { %141 = sbr.rel (%p138_p10) target bundleno = 359 (0x167), region = 28  ;;  %s160_s13 = sand.u32 (!%p138_p10), 1, %s1016_s15  }
  0x12   : > { %s729_s0 = sshll.u32 (!%p138_p10), %s160_s13, 2  ;;  %s733_s20 = sshll.u32 (!%p138_p10), %s1024_s17, 6 }
  0x13   : > { %s162_s24 = scalar_lea.vmem (!%p138_p10), [#allocation4], %s729_s0  ;;  %s1525_s4 = scalar_lea.hbm (!%p138_p10), %s1568_s3, %s733_s20 }
  0x14   : > { %s647_s27 = sshll.u32 (!%p138_p10), %s162_s24, 4  ;;  %s633_s5 = scalar_lea.sflag (!%p138_p10), [#allocation5], %s160_s13  ;;  %s648_s27 = int_to_ptr.vmem [resolvable:$true] %s647_s27 }
  0x15   : > { %s956_s6 = scalar_lea.vmem (!%p138_p10), %s648_s27, 64 }
  0x16   : > { %v236_v0 = vld [vmem:[%s1567_s2 + $0xf8] sm:$0xff]  ;;  %v235_v4 = vld [vmem:[%s1567_s2 + $0xf0] sm:$0xff]  ;;  %v234_v8 = vld [vmem:[%s1567_s2 + $0xe8] sm:$0xff]  ;;  %s1201_s29 = scalar_select %p163_p11, %s1024_s17, 1 }
  0x17   : > { %v268_v1 = vld [vmem:[%s1567_s2 + $0x1f8] sm:$0xff]  ;;  %737 = vmatprep.subr.mxu0 %v236_v0  ;;  %v267_v5 = vld [vmem:[%s1567_s2 + $0x1f0] sm:$0xff]  ;;  %v266_v9 = vld [vmem:[%s1567_s2 + $0x1e8] sm:$0xff]  ;;  %p957_p12 = scmp.ne.s32.totalorder %s648_s27, %s956_s6 }
  0x18   : > { %v220_v2 = vld [vmem:[%s1567_s2 + $0x78] sm:$0xff]  ;;  %772 = vmatprep.subr.mxu1 %v268_v1  ;;  %v219_v6 = vld [vmem:[%s1567_s2 + $0x70] sm:$0xff]  ;;  %v218_v10 = vld [vmem:[%s1567_s2 + $0x68] sm:$0xff]  ;;  %s736_s28 = sshll.u32 %s1201_s29, 5 }
  0x19   : > { %v252_v3 = vld [vmem:[%s1567_s2 + $0x178] sm:$0xff]  ;;  %738 = vmatpush3.msra.mxu0 %v220_v2  ;;  %v251_v7 = vld [vmem:[%s1567_s2 + $0x170] sm:$0xff]  ;;  %v250_v11 = vld [vmem:[%s1567_s2 + $0x168] sm:$0xff]  ;;  %s1249_s22 = scalar_lea.vmem %s1566_s1, %s736_s28  ;;  %p958_p13 = pnand %p957_p12, %p1098_p4 }
  0x1a   : > { %773 = vmatpush3.msra.mxu1 %v252_v3  ;;  %739 = vmatprep.subr.mxu0 %v235_v4  ;;  %v233_v12 = vld [vmem:[%s1567_s2 + $0xe0] sm:$0xff]  ;;  %v232_v16 = vld [vmem:[%s1567_s2 + $0xd8] sm:$0xff]  ;;  %v231_v20 = vld [vmem:[%s1567_s2 + $0xd0] sm:$0xff]  ;;  %s1034_s28 = smov [#allocation4]  }
  0x1b   : > { %774 = vmatprep.subr.mxu1 %v267_v5  ;;  %740 = vmatpush3.msra.mxu0 %v219_v6  ;;  %v265_v13 = vld [vmem:[%s1567_s2 + $0x1e0] sm:$0xff]  ;;  %v264_v17 = vld [vmem:[%s1567_s2 + $0x1d8] sm:$0xff]  ;;  %v263_v21 = vld [vmem:[%s1567_s2 + $0x1d0] sm:$0xff]  ;;  %p959_p0 = pneg %p958_p13  ;;  %s960_s7 = sshll.u32 %s1034_s28, 4  ;;  %s961_s7 = int_to_ptr.vmem [resolvable:$false] %s960_s7 }
  0x1c   : > { %775 = vmatpush3.msra.mxu1 %v251_v7  ;;  %741 = vmatprep.subr.mxu0 %v234_v8  ;;  %v217_v14 = vld [vmem:[%s1567_s2 + $0x60] sm:$0xff]  ;;  %v216_v18 = vld [vmem:[%s1567_s2 + $0x58] sm:$0xff]  ;;  %v215_v22 = vld [vmem:[%s1567_s2 + $0x50] sm:$0xff]  ;;  %v1325_v7 = vstv %s172_s10  ;;  %s962_s17 = scalar_lea.vmem %s961_s7, 128  ;;  %p963_p1 = scmp.lt.s32.totalorder %s648_s27, %s961_s7 }
  0x1d   : > { %776 = vmatprep.subr.mxu1 %v266_v9  ;;  %v249_v15 = vld [vmem:[%s1567_s2 + $0x160] sm:$0xff]  ;;  %742 = vmatpush3.msra.mxu0 %v218_v10  ;;  %v248_v19 = vld [vmem:[%s1567_s2 + $0x158] sm:$0xff]  ;;  %v247_v23 = vld [vmem:[%s1567_s2 + $0x150] sm:$0xff]  ;;  %p964_p2 = scmp.lt.s32.totalorder %s962_s17, %s956_s6 }
  0x1e   : > { %777 = vmatpush3.msra.mxu1 %v250_v11  ;;  %743 = vmatprep.subr.mxu0 %v233_v12  ;;  %v230_v24 = vld [vmem:[%s1567_s2 + $0xc8] sm:$0xff]  ;;  %v229_v28 = vld [vmem:[%s1567_s2 + $0xc0] sm:$0xff]  ;;  %v228_v32 = vld [vmem:[%s1567_s2 + $0xb8] sm:$0xff] }
  0x1f   : > { %778 = vmatprep.subr.mxu1 %v265_v13  ;;  %744 = vmatpush3.msra.mxu0 %v217_v14  ;;  %v262_v25 = vld [vmem:[%s1567_s2 + $0x1c8] sm:$0xff]  ;;  %v261_v29 = vld [vmem:[%s1567_s2 + $0x1c0] sm:$0xff]  ;;  %v260_v33 = vld [vmem:[%s1567_s2 + $0x1b8] sm:$0xff]  ;;  %p965_p3 = por %p964_p2, %p963_p1 }
  0x20   : > { %779 = vmatpush3.msra.mxu1 %v249_v15  ;;  %745 = vmatprep.subr.mxu0 %v232_v16  ;;  %v214_v26 = vld [vmem:[%s1567_s2 + $0x48] sm:$0xff]  ;;  %v213_v30 = vld [vmem:[%s1567_s2 + $0x40] sm:$0xff]  ;;  %v212_v34 = vld [vmem:[%s1567_s2 + $0x38] sm:$0xff] }
  0x21   : > { %780 = vmatprep.subr.mxu1 %v264_v17  ;;  %746 = vmatpush3.msra.mxu0 %v216_v18  ;;  %v246_v27 = vld [vmem:[%s1567_s2 + $0x148] sm:$0xff]  ;;  %v245_v31 = vld [vmem:[%s1567_s2 + $0x140] sm:$0xff]  ;;  %v244_v35 = vld [vmem:[%s1567_s2 + $0x138] sm:$0xff]  ;;  %p966_p5 = pnand %p965_p3, %p959_p0 }
  0x22   : > { %781 = vmatpush3.msra.mxu1 %v248_v19  ;;  %747 = vmatprep.subr.mxu0 %v231_v20  ;;  %v227_v36 = vld [vmem:[%s1567_s2 + $0xb0] sm:$0xff]  ;;  %v226_v40 = vld [vmem:[%s1567_s2 + $0xa8] sm:$0xff]  ;;  %v225_v44 = vld [vmem:[%s1567_s2 + $0xa0] sm:$0xff] }
  0x23   : > { %782 = vmatprep.subr.mxu1 %v263_v21  ;;  %748 = vmatpush3.msra.mxu0 %v215_v22  ;;  %v259_v37 = vld [vmem:[%s1567_s2 + $0x1b0] sm:$0xff]  ;;  %v258_v41 = vld [vmem:[%s1567_s2 + $0x1a8] sm:$0xff]  ;;  %v257_v45 = vld [vmem:[%s1567_s2 + $0x1a0] sm:$0xff] }
  0x24   : > { %783 = vmatpush3.msra.mxu1 %v247_v23  ;;  %749 = vmatprep.subr.mxu0 %v230_v24  ;;  %v211_v38 = vld [vmem:[%s1567_s2 + $0x30] sm:$0xff]  ;;  %v210_v42 = vld [vmem:[%s1567_s2 + $0x28] sm:$0xff]  ;;  %v209_v46 = vld [vmem:[%s1567_s2 + $0x20] sm:$0xff] }
  0x25   : > { %784 = vmatprep.subr.mxu1 %v262_v25  ;;  %750 = vmatpush3.msra.mxu0 %v214_v26  ;;  %v243_v39 = vld [vmem:[%s1567_s2 + $0x130] sm:$0xff]  ;;  %v242_v43 = vld [vmem:[%s1567_s2 + $0x128] sm:$0xff]  ;;  %v241_v47 = vld [vmem:[%s1567_s2 + $0x120] sm:$0xff] }
  0x26   : > { %785 = vmatpush3.msra.mxu1 %v246_v27  ;;  %751 = vmatprep.subr.mxu0 %v229_v28  ;;  %v176_v48 = vld [vmem:[%s1249_s22] sm:$0xff]  ;;  %v177_v49 = vld [vmem:[%s1249_s22 + $0x8] sm:$0xff]  ;;  %v224_v50 = vld [vmem:[%s1567_s2 + $0x98] sm:$0xff] }
  0x27   : > { %786 = vmatprep.subr.mxu1 %v261_v29  ;;  %752 = vmatpush3.msra.mxu0 %v213_v30  ;;  %v256_v51 = vld [vmem:[%s1567_s2 + $0x198] sm:$0xff]  ;;  %v180_v52 = vmax.f32 %v176_v48, 1e-06  ;;  %v181_v53 = vmax.f32 %v177_v49, 1e-06  ;;  %v223_v56 = vld [vmem:[%s1567_s2 + $0x90] sm:$0xff] }
  0x28   : > { %787 = vmatpush3.msra.mxu1 %v245_v31  ;;  %753 = vmatprep.subr.mxu0 %v228_v32  ;;  %v208_v54 = vld [vmem:[%s1567_s2 + $0x18] sm:$0xff]  ;;  %v255_v57 = vld [vmem:[%s1567_s2 + $0x190] sm:$0xff]  ;;  %v222_v60 = vld [vmem:[%s1567_s2 + $0x88] sm:$0xff] }
  0x29   : > { %788 = vmatprep.subr.mxu1 %v260_v33  ;;  %754 = vmatpush3.msra.mxu0 %v212_v34  ;;  %v240_v55 = vld [vmem:[%s1567_s2 + $0x118] sm:$0xff]  ;;  %934 = vlog2.f32 %v180_v52  ;;  %v207_v58 = vld [vmem:[%s1567_s2 + $0x10] sm:$0xff]  ;;  %v254_v61 = vld [vmem:[%s1567_s2 + $0x188] sm:$0xff] }
  0x2a   : > { %789 = vmatpush3.msra.mxu1 %v244_v35  ;;  %755 = vmatprep.subr.mxu0 %v227_v36  ;;  %v239_v59 = vld [vmem:[%s1567_s2 + $0x110] sm:$0xff]  ;;  %936 = vlog2.f32 %v181_v53  ;;  %v206_v62 = vld [vmem:[%s1567_s2 + $0x8] sm:$0xff]  ;;  %v221_v0 = vld [vmem:[%s1567_s2 + $0x80] sm:$0xff] }
  0x2b   : > { %790 = vmatprep.subr.mxu1 %v259_v37  ;;  %756 = vmatpush3.msra.mxu0 %v211_v38  ;;  %v238_v63 = vld [vmem:[%s1567_s2 + $0x108] sm:$0xff]  ;;  %v253_v1 = vld [vmem:[%s1567_s2 + $0x180] sm:$0xff]  ;;  %v300_v4 = vld [vmem:[%s1567_s2 + $0x2f8] sm:$0xff] }
  0x2c   : > { %791 = vmatpush3.msra.mxu1 %v243_v39  ;;  %757 = vmatprep.subr.mxu0 %v226_v40  ;;  %v205_v2 = vld [vmem:[%s1567_s2] sm:$0xff]  ;;  %v332_v5 = vld [vmem:[%s1567_s2 + $0x3f8] sm:$0xff]  ;;  %v178_v15 = vld [vmem:[%s1249_s22 + $0x10] sm:$0xff] }
  0x2d   : > { %792 = vmatprep.subr.mxu1 %v258_v41  ;;  %758 = vmatpush3.msra.mxu0 %v210_v42  ;;  %v237_v3 = vld [vmem:[%s1567_s2 + $0x100] sm:$0xff]  ;;  %v182_v16 = vmax.f32 %v178_v15, 1e-06  ;;  %v179_v17 = vld [vmem:[%s1249_s22 + $0x18] sm:$0xff]  ;;  %v299_v27 = vld [vmem:[%s1567_s2 + $0x2f0] sm:$0xff] }
  0x2e   : > { %793 = vmatpush3.msra.mxu1 %v242_v43  ;;  %759 = vmatprep.subr.mxu0 %v225_v44  ;;  %v183_v18 = vmax.f32 %v179_v17, 1e-06  ;;  %v284_v24 = vld [vmem:[%s1567_s2 + $0x278] sm:$0xff]  ;;  %v331_v28 = vld [vmem:[%s1567_s2 + $0x3f0] sm:$0xff]  ;;  %v298_v32 = vld [vmem:[%s1567_s2 + $0x2e8] sm:$0xff] }
  0x2f   : > { %794 = vmatprep.subr.mxu1 %v257_v45  ;;  %760 = vmatpush3.msra.mxu0 %v209_v46  ;;  %v316_v26 = vld [vmem:[%s1567_s2 + $0x378] sm:$0xff]  ;;  %v283_v29 = vld [vmem:[%s1567_s2 + $0x270] sm:$0xff]  ;;  %v330_v34 = vld [vmem:[%s1567_s2 + $0x3e8] sm:$0xff] }
  0x30   : > { %795 = vmatpush3.msra.mxu1 %v241_v47  ;;  %761 = vmatprep.subr.mxu0 %v224_v50  ;;  %v315_v31 = vld [vmem:[%s1567_s2 + $0x370] sm:$0xff]  ;;  %v282_v35 = vld [vmem:[%s1567_s2 + $0x268] sm:$0xff]  ;;  %v297_v37 = vld [vmem:[%s1567_s2 + $0x2e0] sm:$0xff] }
  0x31   : > { %796 = vmatprep.subr.mxu1 %v256_v51  ;;  %762 = vmatpush3.msra.mxu0 %v208_v54  ;;  %v314_v36 = vld [vmem:[%s1567_s2 + $0x368] sm:$0xff]  ;;  %v329_v38 = vld [vmem:[%s1567_s2 + $0x3e0] sm:$0xff]  ;;  %v296_v42 = vld [vmem:[%s1567_s2 + $0x2d8] sm:$0xff] }
  0x32   : > { %797 = vmatpush3.msra.mxu1 %v240_v55  ;;  %763 = vmatprep.subr.mxu0 %v223_v56  ;;  %v281_v39 = vld [vmem:[%s1567_s2 + $0x260] sm:$0xff]  ;;  %v328_v44 = vld [vmem:[%s1567_s2 + $0x3d8] sm:$0xff]  ;;  %v295_v47 = vld [vmem:[%s1567_s2 + $0x2d0] sm:$0xff] }
  0x33   : > { %798 = vmatprep.subr.mxu1 %v255_v57  ;;  %764 = vmatpush3.msra.mxu0 %v207_v58  ;;  %v313_v41 = vld [vmem:[%s1567_s2 + $0x360] sm:$0xff]  ;;  %v280_v45 = vld [vmem:[%s1567_s2 + $0x258] sm:$0xff]  ;;  %v327_v48 = vld [vmem:[%s1567_s2 + $0x3d0] sm:$0xff] }
  0x34   : > { %799 = vmatpush3.msra.mxu1 %v239_v59  ;;  %765 = vmatprep.subr.mxu0 %v222_v60  ;;  %v312_v46 = vld [vmem:[%s1567_s2 + $0x358] sm:$0xff]  ;;  %v279_v49 = vld [vmem:[%s1567_s2 + $0x250] sm:$0xff]  ;;  %v294_v52 = vld [vmem:[%s1567_s2 + $0x2c8] sm:$0xff] }
  0x35   : > { %800 = vmatprep.subr.mxu1 %v254_v61  ;;  %766 = vmatpush3.msra.mxu0 %v206_v62  ;;  %v311_v51 = vld [vmem:[%s1567_s2 + $0x350] sm:$0xff]  ;;  %v326_v54 = vld [vmem:[%s1567_s2 + $0x3c8] sm:$0xff]  ;;  %v293_v57 = vld [vmem:[%s1567_s2 + $0x2c0] sm:$0xff] }
  0x36   : > { %801 = vmatpush3.msra.mxu1 %v238_v63  ;;  %767 = vmatprep.subr.mxu0 %v221_v0  ;;  %v935_v6 = vpop.eup %934  ;;  %v278_v55 = vld [vmem:[%s1567_s2 + $0x248] sm:$0xff]  ;;  %v325_v58 = vld [vmem:[%s1567_s2 + $0x3c0] sm:$0xff]  ;;  %v292_v61 = vld [vmem:[%s1567_s2 + $0x2b8] sm:$0xff] }
  0x37   : > { %802 = vmatprep.subr.mxu1 %v253_v1  ;;  %768 = vmatpush3.msra.mxu0 %v205_v2  ;;  %v937_v8 = vpop.eup %936  ;;  %v185_v9 = vmul.f32 0.6931472, %v935_v6  ;;  %v310_v56 = vld [vmem:[%s1567_s2 + $0x348] sm:$0xff]  ;;  %v277_v59 = vld [vmem:[%s1567_s2 + $0x240] sm:$0xff]  ;;  %v324_v62 = vld [vmem:[%s1567_s2 + $0x3b8] sm:$0xff] }
  0x38   : > { %803 = vmatpush3.msra.mxu1 %v237_v3  ;;  %807 = vmatprep.subr.mxu0 %v300_v4  ;;  %v187_v10 = vmul.f32 0.6931472, %v937_v8  ;;  %v309_v60 = vld [vmem:[%s1567_s2 + $0x340] sm:$0xff]  ;;  %v276_v63 = vld [vmem:[%s1567_s2 + $0x238] sm:$0xff]  ;;  %v291_v1 = vld [vmem:[%s1567_s2 + $0x2b0] sm:$0xff] }
  0x39   : > { %842 = vmatprep.subr.mxu1 %v332_v5  ;;  %v193_v11 = vmul.f32 %v185_v9, %v1325_v7  ;;  %v308_v0 = vld [vmem:[%s1567_s2 + $0x338] sm:$0xff]  ;;  %v323_v2 = vld [vmem:[%s1567_s2 + $0x3b0] sm:$0xff]  ;;  %v290_v5 = vld [vmem:[%s1567_s2 + $0x2a8] sm:$0xff] }
  0x3a   : > { %v194_v12 = vmul.f32 %v187_v10, %v1325_v7  ;;  %v275_v3 = vld [vmem:[%s1567_s2 + $0x230] sm:$0xff]  ;;  %v322_v6 = vld [vmem:[%s1567_s2 + $0x3a8] sm:$0xff]  ;;  %v289_v10 = vld [vmem:[%s1567_s2 + $0x2a0] sm:$0xff] }
  0x3b   : > { %v197_v13 = vmul.f32 1.442695, %v193_v11  ;;  %v307_v4 = vld [vmem:[%s1567_s2 + $0x330] sm:$0xff]  ;;  %v274_v8 = vld [vmem:[%s1567_s2 + $0x228] sm:$0xff]  ;;  %v321_v11 = vld [vmem:[%s1567_s2 + $0x3a0] sm:$0xff] }
  0x3c   : > { %v199_v14 = vmul.f32 1.442695, %v194_v12  ;;  %v306_v9 = vld [vmem:[%s1567_s2 + $0x328] sm:$0xff]  ;;  %v273_v12 = vld [vmem:[%s1567_s2 + $0x220] sm:$0xff]  ;;  %v320_v15 = vld [vmem:[%s1567_s2 + $0x398] sm:$0xff] }
  0x3d   : > { %938 = vpow2.f32 %v197_v13  ;;  %v305_v13 = vld [vmem:[%s1567_s2 + $0x320] sm:$0xff]  ;;  %v304_v17 = vld [vmem:[%s1567_s2 + $0x318] sm:$0xff] }
  0x3e   : > { %940 = vpow2.f32 %v199_v14  ;;  %v288_v14 = vld [vmem:[%s1567_s2 + $0x298] sm:$0xff] }
  0x3f   : > { %942 = vlog2.f32 %v182_v16  ;;  %v272_v16 = vld [vmem:[%s1567_s2 + $0x218] sm:$0xff] }
  0x40   : > { %944 = vlog2.f32 %v183_v18  ;;  %v287_v18 = vld [vmem:[%s1567_s2 + $0x290] sm:$0xff] }
  0x4a   : > { %v939_v19 = vpop.eup %938 }
  0x4b   : > { %v941_v20 = vpop.eup %940  ;;  %v337_v21 = vcombine.high %v939_v19, %v939_v19 }
  0x4c   : > { %v943_v22 = vpop.eup %942  ;;  %v338_v23 = vcombine.high %v941_v20, %v941_v20 }
  0x4d   : > { %v945_v25 = vpop.eup %944  ;;  %409 = vmatprep.mubr.f32.mxu0 %v337_v21  ;;  %v189_v30 = vmul.f32 0.6931472, %v943_v22  ;;  %v303_v22 = vld [vmem:[%s1567_s2 + $0x310] sm:$0xff] }
  0x4e   : > { %479 = vmatprep.mubr.f32.mxu1 %v338_v23  ;;  %410 = vmatmul.mubr.f32.vlgmr.msra.gmra.mxu0 %v939_v19  ;;  %v191_v33 = vmul.f32 0.6931472, %v945_v25  ;;  %v319_v19 = vld [vmem:[%s1567_s2 + $0x390] sm:$0xff]  ;;  %v286_v23 = vld [vmem:[%s1567_s2 + $0x288] sm:$0xff] }
  0x4f   : > { %480 = vmatmul.mubr.f32.vlgmr.msra.gmra.mxu1 %v941_v20  ;;  %808 = vmatpush3.msra.mxu0 %v284_v24  ;;  %v195_v40 = vmul.f32 %v189_v30, %v1325_v7  ;;  %v271_v20 = vld [vmem:[%s1567_s2 + $0x210] sm:$0xff]  ;;  %v318_v25 = vld [vmem:[%s1567_s2 + $0x388] sm:$0xff]  ;;  %v269_v30 = vld [vmem:[%s1567_s2 + $0x200] sm:$0xff] }
  0x50   : > { %843 = vmatpush3.msra.mxu1 %v316_v26  ;;  %809 = vmatprep.subr.mxu0 %v299_v27  ;;  %v196_v43 = vmul.f32 %v191_v33, %v1325_v7  ;;  %v270_v26 = vld [vmem:[%s1567_s2 + $0x208] sm:$0xff] }
  0x51   : > { %844 = vmatprep.subr.mxu1 %v331_v28  ;;  %810 = vmatpush3.msra.mxu0 %v283_v29  ;;  %v201_v50 = vmul.f32 1.442695, %v195_v40  ;;  %v302_v27 = vld [vmem:[%s1567_s2 + $0x308] sm:$0xff]  ;;  %v285_v28 = vld [vmem:[%s1567_s2 + $0x280] sm:$0xff] }
  0x52   : > { %845 = vmatpush3.msra.mxu1 %v315_v31  ;;  %811 = vmatprep.subr.mxu0 %v298_v32  ;;  %v203_v53 = vmul.f32 1.442695, %v196_v43  ;;  %v317_v29 = vld [vmem:[%s1567_s2 + $0x380] sm:$0xff] }
  0x53   : > { %846 = vmatprep.subr.mxu1 %v330_v34  ;;  %812 = vmatpush3.msra.mxu0 %v282_v35  ;;  %946 = vpow2.f32 %v201_v50  ;;  %v301_v32 = vld [vmem:[%s1567_s2 + $0x300] sm:$0xff] }
  0x54   : > { %847 = vmatpush3.msra.mxu1 %v314_v36  ;;  %813 = vmatprep.subr.mxu0 %v297_v37  ;;  %948 = vpow2.f32 %v203_v53 }
  0x55   : > { %848 = vmatprep.subr.mxu1 %v329_v38  ;;  %814 = vmatpush3.msra.mxu0 %v281_v39  ;;  %950 = vrcp.f32 %v1325_v7 }
  0x56   : > { %849 = vmatpush3.msra.mxu1 %v313_v41  ;;  %815 = vmatprep.subr.mxu0 %v296_v42 }
  0x57   : > { %850 = vmatprep.subr.mxu1 %v328_v44  ;;  %816 = vmatpush3.msra.mxu0 %v280_v45 }
  0x58   : > { %851 = vmatpush3.msra.mxu1 %v312_v46  ;;  %817 = vmatprep.subr.mxu0 %v295_v47 }
  0x59   : > { %852 = vmatprep.subr.mxu1 %v327_v48  ;;  %818 = vmatpush3.msra.mxu0 %v279_v49 }
  0x5a   : > { %853 = vmatpush3.msra.mxu1 %v311_v51  ;;  %819 = vmatprep.subr.mxu0 %v294_v52 }
  0x5b   : > { %854 = vmatprep.subr.mxu1 %v326_v54  ;;  %820 = vmatpush3.msra.mxu0 %v278_v55 }
  0x5c   : > { %855 = vmatpush3.msra.mxu1 %v310_v56  ;;  %821 = vmatprep.subr.mxu0 %v293_v57 }
  0x5d   : > { %856 = vmatprep.subr.mxu1 %v325_v58  ;;  %822 = vmatpush3.msra.mxu0 %v277_v59 }
  0x5e   : > { %857 = vmatpush3.msra.mxu1 %v309_v60  ;;  %823 = vmatprep.subr.mxu0 %v292_v61 }
  0x5f   : > { %858 = vmatprep.subr.mxu1 %v324_v62  ;;  %824 = vmatpush3.msra.mxu0 %v276_v63 }
  0x60   : > { %859 = vmatpush3.msra.mxu1 %v308_v0  ;;  %825 = vmatprep.subr.mxu0 %v291_v1  ;;  %v947_v21 = vpop.eup %946 }
  0x61   : > { %860 = vmatprep.subr.mxu1 %v323_v2  ;;  %826 = vmatpush3.msra.mxu0 %v275_v3  ;;  %v949_v24 = vpop.eup %948  ;;  %v339_v31 = vcombine.high %v947_v21, %v947_v21 }
  0x62   : > { %861 = vmatpush3.msra.mxu1 %v307_v4  ;;  %827 = vmatprep.subr.mxu0 %v290_v5  ;;  %v340_v33 = vcombine.high %v949_v24, %v949_v24  ;;  %v951_v34 = vpop.eup %950 }
  0x63   : > { %862 = vmatprep.subr.mxu1 %v322_v6  ;;  %828 = vmatpush3.msra.mxu0 %v274_v8  ;;  %877 = vpush %v951_v34 }
  0x64   : > { %863 = vmatpush3.msra.mxu1 %v306_v9  ;;  %829 = vmatprep.subr.mxu0 %v289_v10 }
  0x65   : > { %864 = vmatprep.subr.mxu1 %v321_v11  ;;  %830 = vmatpush3.msra.mxu0 %v273_v12 }
  0x66   : > { %865 = vmatpush3.msra.mxu1 %v305_v13  ;;  %831 = vmatprep.subr.mxu0 %v288_v14 }
  0x67   : > { %866 = vmatprep.subr.mxu1 %v320_v15  ;;  %832 = vmatpush3.msra.mxu0 %v272_v16 }
  0x68   : > { %867 = vmatpush3.msra.mxu1 %v304_v17  ;;  %833 = vmatprep.subr.mxu0 %v287_v18 }
  0x69   : > { %868 = vmatprep.subr.mxu1 %v319_v19  ;;  %834 = vmatpush3.msra.mxu0 %v271_v20 }
  0x6a   : > { %869 = vmatpush3.msra.mxu1 %v303_v22  ;;  %835 = vmatprep.subr.mxu0 %v286_v23 }
  0x6b   : > { %870 = vmatprep.subr.mxu1 %v318_v25  ;;  %836 = vmatpush3.msra.mxu0 %v270_v26 }
  0x6c   : > { %871 = vmatpush3.msra.mxu1 %v302_v27  ;;  %837 = vmatprep.subr.mxu0 %v285_v28 }
  0x6d   : > { %872 = vmatprep.subr.mxu1 %v317_v29  ;;  %838 = vmatpush3.msra.mxu0 %v269_v30 }
  0x6e   : > { %549 = vmatprep.mubr.f32.mxu0 %v339_v31  ;;  %873 = vmatpush3.msra.mxu1 %v301_v32 }
  0x6f   : > { %619 = vmatprep.mubr.f32.mxu1 %v340_v33  ;;  %550 = vmatmul.mubr.f32.vlgmr.msra.gmra.mxu0 %v947_v21 }
  0x70   : > { %620 = vmatmul.mubr.f32.vlgmr.msra.gmra.mxu1 %v949_v24 }
  0x94   : > { %s878_s12 = spop %877 }
  0x95   : > { %v627_v50 = vstv %s878_s12 }
 0x10e   : > { %v769_v35 = vpop.f32.mrf.mxu0 }
 0x10f   : > { %v804_v36 = vpop.f32.mrf.mxu1 }
 0x110   : > { %v770_v37 = vpop.f32.mrf.mxu0 }
 0x111   : > { %v805_v38 = vpop.f32.mrf.mxu1  ;;  %v771_v39 = vadd.f32 %v770_v37, %v769_v35 }
 0x112   : > { %v806_v40 = vadd.f32 %v805_v38, %v804_v36 }
 0x114   : > { %v482_v44 = vadd.f32 %v806_v40, %v771_v39 }
 0x12f   : > { %v839_v41 = vpop.f32.mrf.mxu0 }
 0x130   : > { %v874_v42 = vpop.f32.mrf.mxu1 }
 0x131   : > { %v840_v43 = vpop.f32.mrf.mxu0 }
 0x132   : > { %v841_v45 = vadd.f32 %v840_v43, %v839_v41  ;;  %v875_v46 = vpop.f32.mrf.mxu1 }
 0x133   : > { %v876_v48 = vadd.f32 %v875_v46, %v874_v42 }
 0x134   : > { %v552_v47 = vadd.f32 %v841_v45, %v482_v44 }
 0x136   : > { %v622_v49 = vadd.f32 %v876_v48, %v552_v47 }
 0x138   : > { %952 = vlog2.f32 %v622_v49 }
 0x145   : > { %v953_v7 = vpop.eup %952 }
 0x146   : > { %v626_v51 = vmul.f32 0.6931472, %v953_v7 }
 0x148   : > { %v628_v52 = vmul.f32 %v627_v50, %v626_v51 }
 0x14a   : > { %v629_v53 = vmul.f32 1.442695, %v628_v52 }
 0x14c   : > { %954 = vpow2.f32 %v629_v53 }
 0x159   : > { %v955_v54 = vpop.eup %954 }
 0x15a   : > { %631 = vst [vmem:[%s162_s24] sm:$0xf] %v955_v54 }
 0x15b   : > { %969 = shalt.err (!%p966_p5)
}
 0x15c   : > { %s970_s8 = scalar_lea.hbm %s1525_s4, 64  ;;  %s974_s29 = scalar_lea.hbm %s1568_s3, 128 }
 0x15d   : > { %p971_p6 = scmp.ne.s32.totalorder %s1525_s4, %s970_s8  ;;  %p975_p10 = scmp.lt.s32.totalorder %s1525_s4, %s1568_s3 }
 0x15e   : > { %p976_p11 = scmp.lt.s32.totalorder %s974_s29, %s970_s8 }
 0x15f   : > { %p972_p7 = pnand %p971_p6, %p1098_p4 }
 0x160   : > { %p977_p12 = por %p976_p11, %p975_p10 }
 0x161   : > { %p973_p9 = pneg %p972_p7 }
 0x163   : > { %p978_p13 = pnand %p977_p12, %p973_p9 }
 0x165   : > { %981 = shalt.err (!%p978_p13)
}
 0x166   : > { %879 = dma.vmem_to_hbm [thread:$0]  (%p1098_p4), %s648_s27, 64, %s1525_s4, %s633_s5  }
 0x167 PF: > { %p885_p0 = scmp.ge.s32.totalorder %s1032_s19, 2  ;;  %s659_s13 = sand.u32 1, %s1012_s14  }
 0x168   : > { %s660_s0 = scalar_lea.sflag [#allocation5], %s659_s13 }
 0x169   : > { %p882_p1 = pnand %p885_p0, %p1105_p8 }
 0x16b   : > { %p883_p2 = pneg %p882_p1 }
 0x16d   : > { %1007 = dma.done.wait (%p883_p2), %s660_s0, 64  }
 0x16e   : > { %1009 = vsyncadd (%p883_p2), %s660_s0, 4294967232  ;;  %s17_s19 = sadd.s32 1, %s1032_s19   ;;  %s1571_s14 = smov %s1016_s15 }
 0x16f   : > { %p14_p3 = scmp.ge.s32.totalorder %s17_s19, 4   ;;  %s1572_s15 = smov %s1020_s16 }
 0x170   : > { %s1573_s16 = smov %s1111_s26  ;;  %s1574_s17 = smov %s1028_s18 }
 0x171   : > { %s1575_s18 = smov %s1577_s21  ;;  %16 = sbr.rel (!%p14_p3) target bundleno = 6 (0x6), region = 63 }
 0x176   :  { %665 = vsyncpa [#allocation5], 1 }
 0x177   :  { %667 = vsyncpa [#allocation5 + $0x1], 1 }

</bundles_post_ra>
